<compile_context>
chip_gen: v7x
topology: tpu7x:2x2x1
jax: 0.10.0
libtpu: 0.0.40
codegen_flags: <defaults>
</compile_context>

<pallas_src>
import functools

import jax
import jax.numpy as jnp
from jax import lax
from jax.experimental import pallas as pl
from jax.experimental.pallas import tpu as pltpu

EPS = 1e-5
LANE = 128
ACT_DTYPE = jnp.bfloat16   # inter-stage activation + residual storage (halves HBM traffic)
MXU_DTYPE = jnp.bfloat16   # matmul operand dtype (f32 accumulation on the MXU)
OUT_DTYPE = jnp.float32    # final output dtype (set to bfloat16 to also halve the last write)


def _round_up(x, m):
    return (x + m - 1) // m * m


def _choose_tile_l(l, cap=1024):
    """L-tile: multiple of 8, <= cap, chosen to minimise L padding."""
    if l <= cap:
        return _round_up(l, 8)
    best_t, best_pad = None, None
    for t in range(cap - cap % 8, 7, -8):
        pad = (-l) % t
        if best_pad is None or pad < best_pad:
            best_t, best_pad = t, pad
        if pad == 0:
            break
    return best_t


def _vmem_limit_bytes():
    # Generation-aware scoped-VMEM budget: v5e/v6e (128 MiB physical) -> 48 MiB,
    # v7x (64 MiB physical) -> 32 MiB.  After L-tiling every per-step working set
    # is well under 2 MiB, so this is pure headroom.
    try:
        phys = pltpu.get_tpu_info().vmem_capacity_bytes
    except Exception:  # interpret mode / non-TPU backend
        phys = 64 * 1024 * 1024
    return 48 * 1024 * 1024 if phys >= 96 * 1024 * 1024 else 32 * 1024 * 1024


def _cparams():
    return pltpu.CompilerParams(dimension_semantics=("parallel", "parallel"),
                                vmem_limit_bytes=_vmem_limit_bytes())


def _store_stats(y, st_ref):
    # Per-tile partial sums for single-pass batch statistics, packed into one
    # (1, 1, 2, C) block: row 0 = sum, row 1 = sum of squares.
    s = jnp.sum(y, axis=0, keepdims=True)
    ss = jnp.sum(y * y, axis=0, keepdims=True)
    st_ref[0, 0] = jnp.concatenate([s, ss], axis=0)


# ----------------------------- stage kernels ---------------------------------

def _stage1_kernel(x_ref, w1_ref, y_ref, st_ref):
    # conv1 (1x1): channel matmul on the MXU (bf16 operands, f32 accumulation).
    y = jnp.dot(x_ref[0].astype(MXU_DTYPE), w1_ref[...],
                preferred_element_type=jnp.float32)
    y_ref[0] = y.astype(y_ref.dtype)
    _store_stats(y, st_ref)


def _stage2_kernel(y1_ref, prev_ref, next_ref, w2_ref, sc_ref, sh_ref,
                   y2_ref, st_ref, *, true_l, padded):
    # BN1 (folded scale/shift) + ReLU, then conv2 (k=3, pad=1) as three
    # accumulating K=C bf16 matmuls over the L-tile plus its +-1-row halo.
    a = jnp.maximum(y1_ref[0].astype(jnp.float32) * sc_ref[...] + sh_ref[...], 0.0)
    tl = a.shape[0]
    if padded:  # zero padded tail rows: conv zero-padding + clean BN statistics
        g_row = pl.program_id(1) * tl + lax.broadcasted_iota(jnp.int32, a.shape, 0)
        a = jnp.where(g_row < true_l, a, 0.0)
    a = a.astype(MXU_DTYPE)
    prev = prev_ref[0, 0].astype(MXU_DTYPE)   # (1, C): BN'd row just before the tile
    nxt = next_ref[0, 0].astype(MXU_DTYPE)    # (1, C): BN'd row just after the tile
    a_left = jnp.concatenate([prev, a[:tl - 1]], axis=0)   # a[l-1]
    a_right = jnp.concatenate([a[1:], nxt], axis=0)        # a[l+1]
    y = (jnp.dot(a, w2_ref[1], preferred_element_type=jnp.float32)
         + jnp.dot(a_left, w2_ref[0], preferred_element_type=jnp.float32)
         + jnp.dot(a_right, w2_ref[2], preferred_element_type=jnp.float32))
    if padded:
        y = jnp.where(g_row < true_l, y, 0.0)
    y2_ref[0] = y.astype(y2_ref.dtype)
    _store_stats(y, st_ref)


def _stage3_kernel(y2_ref, w3_ref, sc_ref, sh_ref, y3_ref, st_ref, *, true_l, padded):
    # BN2 (folded) + ReLU, then conv3 (1x1).
    a = jnp.maximum(y2_ref[0].astype(jnp.float32) * sc_ref[...] + sh_ref[...], 0.0)
    if padded:
        g_row = (pl.program_id(1) * a.shape[0]
                 + lax.broadcasted_iota(jnp.int32, a.shape, 0))
        a = jnp.where(g_row < true_l, a, 0.0)
    y = jnp.dot(a.astype(MXU_DTYPE), w3_ref[...], preferred_element_type=jnp.float32)
    y3_ref[0] = y.astype(y3_ref.dtype)
    _store_stats(y, st_ref)


def _stage4_kernel(y3_ref, x_ref, sc_ref, sh_ref, o_ref):
    # BN3 (folded) + residual add + ReLU.
    y = y3_ref[0].astype(jnp.float32) * sc_ref[...] + sh_ref[...]
    o_ref[0] = jnp.maximum(y + x_ref[0].astype(jnp.float32), 0.0).astype(o_ref.dtype)


# ------------------------------- wrapper --------------------------------------

def _fold_bn(stats, gamma_p, beta_p, count):
    # stats: (N_grid, L_grid, 2, C) per-tile [sum, sumsq] -> per-channel folded BN.
    tot = jnp.sum(stats, axis=(0, 1))                       # (2, C)
    mean = tot[0] / count
    var = jnp.maximum(tot[1] / count - mean * mean, 0.0)    # biased, single pass
    scale = gamma_p[0] * lax.rsqrt(var + EPS)
    shift = beta_p[0] - mean * scale
    return scale[None, :], shift[None, :]                    # (1, C) f32 each


@functools.partial(jax.jit, static_argnames=("tile_cap",))
def bottleneck_forward(x_nlc, params, tile_cap=1024):
    (w1, g1, b1, w2, g2, b2, w3, g3, b3) = params
    n, l, c_in = x_nlc.shape
    c_out = w1.shape[1]
    assert c_in == c_out, "identity residual requires in_channels == out_channels"

    cp = _round_up(c_out, LANE)          # channels padded to 128 -> lane-dense stores
    pc = cp - c_out
    tl = _choose_tile_l(l, tile_cap)     # L-tile (multiple of 8)
    lp = _round_up(l, tl)                # padded length
    gl = lp // tl
    padded = lp != l
    count = float(n * l)
    rows = n * lp

    # Zero-pad channels / length.  Padded channels stay exactly zero through every
    # stage (gamma/beta padded with 0 -> scale = shift = 0); padded L rows are
    # masked inside stages 2/3 so they never contaminate BN statistics.
    x_p = jnp.pad(x_nlc, ((0, 0), (0, lp - l), (0, pc))).astype(ACT_DTYPE)
    w1_p = jnp.pad(w1, ((0, pc), (0, pc))).astype(MXU_DTYPE)
    w2_p = jnp.pad(w2, ((0, 0), (0, pc), (0, pc))).astype(MXU_DTYPE)   # (3, C, C)
    w3_p = jnp.pad(w3, ((0, pc), (0, pc))).astype(MXU_DTYPE)
    pad_gb = lambda v: jnp.pad(v, ((0, 0), (0, pc))).astype(jnp.float32)
    g1p, b1p, g2p, b2p, g3p, b3p = map(pad_gb, (g1, b1, g2, b2, g3, b3))

    cpar = _cparams()
    act_spec = pl.BlockSpec((1, tl, cp), lambda i, j: (i, j, 0))
    vec_spec = pl.BlockSpec((1, cp), lambda i, j: (0, 0))
    st_spec = pl.BlockSpec((1, 1, 2, cp), lambda i, j: (i, j, 0, 0))
    halo_spec = pl.BlockSpec((1, 1, 1, cp), lambda i, j: (i, j, 0, 0))
    st_shape = jax.ShapeDtypeStruct((n, gl, 2, cp), jnp.float32)
    act_shape = jax.ShapeDtypeStruct((n, lp, cp), ACT_DTYPE)

    # ---- stage 1: conv1 (1x1) ------------------------------------------------
    y1, st1 = pl.pallas_call(
        _stage1_kernel,
        out_shape=(act_shape, st_shape),
        grid=(n, gl),
        in_specs=[act_spec, pl.BlockSpec((cp, cp), lambda i, j: (0, 0))],
        out_specs=(act_spec, st_spec),
        compiler_params=cpar,
        cost_estimate=pl.CostEstimate(
            flops=2 * rows * cp * cp, transcendentals=0,
            bytes_accessed=2 * rows * cp * 2 + cp * cp * 2),
    )(x_p, w1_p)
    sc1, sh1 = _fold_bn(st1, g1p, b1p, count)

    # ---- stage-2 halo rows: BN1+ReLU'd boundary rows of each L-tile ----------
    idx_prev = jnp.arange(gl) * tl - 1        # feeds the first output row of tile j
    idx_next = (jnp.arange(gl) + 1) * tl      # feeds the last output row of tile j

    def _halo(idx):
        valid = (idx >= 0) & (idx < l)        # outside [0, l): conv2 zero padding
        r = jnp.take(y1, jnp.clip(idx, 0, lp - 1), axis=1).astype(jnp.float32)
        r = jnp.maximum(r * sc1 + sh1, 0.0)
        r = jnp.where(valid[None, :, None], r, 0.0)
        return r[:, :, None, :].astype(ACT_DTYPE)            # (n, gl, 1, cp)

    prev_a, next_a = _halo(idx_prev), _halo(idx_next)

    # ---- stage 2: BN1 + ReLU + conv2 (k=3, pad=1) ----------------------------
    y2, st2 = pl.pallas_call(
        functools.partial(_stage2_kernel, true_l=l, padded=padded),
        out_shape=(act_shape, st_shape),
        grid=(n, gl),
        in_specs=[act_spec, halo_spec, halo_spec,
                  pl.BlockSpec((3, cp, cp), lambda i, j: (0, 0, 0)),
                  vec_spec, vec_spec],
        out_specs=(act_spec, st_spec),
        compiler_params=cpar,
        cost_estimate=pl.CostEstimate(
            flops=6 * rows * cp * cp, transcendentals=0,
            bytes_accessed=2 * rows * cp * 2 + 3 * cp * cp * 2),
    )(y1, prev_a, next_a, w2_p, sc1, sh1)
    sc2, sh2 = _fold_bn(st2, g2p, b2p, count)

    # ---- stage 3: BN2 + ReLU + conv3 (1x1) -----------------------------------
    y3, st3 = pl.pallas_call(
        functools.partial(_stage3_kernel, true_l=l, padded=padded),
        out_shape=(act_shape, st_shape),
        grid=(n, gl),
        in_specs=[act_spec, pl.BlockSpec((cp, cp), lambda i, j: (0, 0)),
                  vec_spec, vec_spec],
        out_specs=(act_spec, st_spec),
        compiler_params=cpar,
        cost_estimate=pl.CostEstimate(
            flops=2 * rows * cp * cp, transcendentals=0,
            bytes_accessed=2 * rows * cp * 2 + cp * cp * 2),
    )(y2, w3_p, sc2, sh2)
    sc3, sh3 = _fold_bn(st3, g3p, b3p, count)

    # ---- stage 4: BN3 + residual add + ReLU ----------------------------------
    out_p = pl.pallas_call(
        _stage4_kernel,
        out_shape=jax.ShapeDtypeStruct((n, lp, cp), OUT_DTYPE),
        grid=(n, gl),
        in_specs=[act_spec, act_spec, vec_spec, vec_spec],
        out_specs=act_spec,
        compiler_params=cpar,
        cost_estimate=pl.CostEstimate(
            flops=4 * rows * cp, transcendentals=0,
            bytes_accessed=2 * rows * cp * 2 + rows * cp * 4),
    )(y3, x_p, sc3, sh3)

    # Slice back to the un-padded extent inside the jitted graph (fuses with the
    # surrounding ops; padded rows/channels are dropped here).
    return out_p[:, :l, :c_out]


# ------------------------------ references ------------------------------------

def reference(x_nlc, params, *, matmul_dtype=jnp.float32, act_dtype=jnp.float32):
    """Pure-JAX reference.  (f32, f32) is the exact PyTorch training-mode forward
    (biased batch variance, eps=1e-5); (bf16, bf16) mirrors the kernel's precision
    choices (bf16 MXU operands / inter-stage + residual storage, f32 stats)."""
    (w1, g1, b1, w2, g2, b2, w3, g3, b3) = params

    def mm(a, w):
        return jnp.einsum('nlc,co->nlo',
                          a.astype(matmul_dtype), w.astype(matmul_dtype),
                          preferred_element_type=jnp.float32,
                          precision=lax.Precision.HIGHEST)

    def bn(y_f32, y_stored, g, b):
        m = jnp.mean(y_f32, axis=(0, 1))
        v = jnp.mean(y_f32 * y_f32, axis=(0, 1)) - m * m
        scale = g[0] * lax.rsqrt(v + EPS)
        shift = b[0] - m * scale
        return y_stored.astype(jnp.float32) * scale + shift

    identity = x_nlc.astype(act_dtype).astype(jnp.float32)
    y1 = mm(x_nlc.astype(act_dtype), w1)
    a1 = jax.nn.relu(bn(y1, y1.astype(act_dtype), g1, b1))
    n, l, c = a1.shape
    zero = jnp.zeros((n, 1, c), a1.dtype)
    a1l = jnp.concatenate([zero, a1[:, :l - 1]], axis=1)     # a1[l-1]
    a1r = jnp.concatenate([a1[:, 1:], zero], axis=1)         # a1[l+1]
    y2 = mm(a1l, w2[0]) + mm(a1, w2[1]) + mm(a1r, w2[2])
    a2 = jax.nn.relu(bn(y2, y2.astype(act_dtype), g2, b2))
    y3 = mm(a2, w3)
    y3n = bn(y3, y3.astype(act_dtype), g3, b3)
    return jax.nn.relu(y3n + identity)


if __name__ == "__main__":
    # Small shapes: batch=2, channels=8 (in == out, expansion=1), length=16.
    N, C, L = 2, 8, 16
    key = jax.random.PRNGKey(0)
    ks = jax.random.split(key, 10)

    x_ncl = jax.random.normal(ks[0], (N, C, L), jnp.float32)   # PyTorch NCL layout

    # Deterministic synthetic parameters, pre-transposed for NLC:
    # conv1/conv3 -> (Cin, Cout), conv2 -> (tap, Cin, Cout), taps = [l-1, l, l+1].
    w1 = jax.random.normal(ks[1], (C, C), jnp.float32) * 0.1
    w2 = jax.random.normal(ks[2], (3, C, C), jnp.float32) * 0.1
    w3 = jax.random.normal(ks[3], (C, C), jnp.float32) * 0.1
    g1 = 1.0 + 0.1 * jax.random.normal(ks[4], (1, C), jnp.float32)
    b1 = 0.1 * jax.random.normal(ks[5], (1, C), jnp.float32)
    g2 = 1.0 + 0.1 * jax.random.normal(ks[6], (1, C), jnp.float32)
    b2 = 0.1 * jax.random.normal(ks[7], (1, C), jnp.float32)
    g3 = 1.0 + 0.1 * jax.random.normal(ks[8], (1, C), jnp.float32)
    b3 = 0.1 * jax.random.normal(ks[9], (1, C), jnp.float32)
    params = (w1, g1, b1, w2, g2, b2, w3, g3, b3)

    x_nlc = jnp.transpose(x_ncl, (0, 2, 1))                   # NCL -> NLC

    out_nlc = jax.block_until_ready(bottleneck_forward(x_nlc, params))
    out_ncl = jnp.transpose(out_nlc, (0, 2, 1))               # back to NCL
    assert out_ncl.shape == (N, C, L)

    # Structural check: reference built with the kernel's precision choices.
    ref_bf16 = reference(x_nlc, params, matmul_dtype=MXU_DTYPE, act_dtype=ACT_DTYPE)
    assert jnp.allclose(out_nlc, ref_bf16, atol=2e-2, rtol=2e-2), \
        "mismatch vs precision-matched reference"

    # Semantics check: exact f32 PyTorch-equivalent math; tolerance reflects the
    # bf16 operand / storage precision trade-off.
    ref_f32 = reference(x_nlc, params)
    assert jnp.allclose(out_nlc, ref_f32, atol=1e-1, rtol=1e-1), \
        "mismatch vs f32 reference"

    # Exercise the multi-tile + padded-L path (forced tile=16, L=44 -> Lpad=48).
    L2 = 44
    x2 = jax.random.normal(jax.random.PRNGKey(1), (N, L2, C), jnp.float32)
    out2 = jax.block_until_ready(bottleneck_forward(x2, params, tile_cap=16))
    assert out2.shape == (N, L2, C)
    ref2 = reference(x2, params, matmul_dtype=MXU_DTYPE, act_dtype=ACT_DTYPE)
    assert jnp.allclose(out2, ref2, atol=2e-2, rtol=2e-2), \
        "mismatch vs precision-matched reference (tiled/padded L)"

    print("KERNEL_OK")
</pallas_src>

<mosaic_0001>
module attributes {stable_mosaic.version = 11 : i64} {
  func.func @_stage1_kernel(%arg0: i32, %arg1: i32, %arg2: memref<1x16x128xbf16, #tpu.memory_space<vmem>>, %arg3: memref<128x128xbf16, #tpu.memory_space<vmem>>, %arg4: memref<1x16x128xbf16, #tpu.memory_space<vmem>>, %arg5: memref<1x1x2x128xf32, #tpu.memory_space<vmem>>) attributes {dimension_semantics = [#tpu.dimension_semantics<parallel>, #tpu.dimension_semantics<parallel>], iteration_bounds = array<i64: 2, 1>, scalar_prefetch = 0 : i64, scratch_operands = 0 : i64, tpu.core_type = #tpu.core_type<tc>, window_params = [{transform_indices = @transform_0, window_bounds = array<i64: 1, 16, 128>}, {pipeline_mode = #tpu.pipeline_mode<synchronous>, transform_indices = @transform_1, window_bounds = array<i64: 128, 128>}, {transform_indices = @transform_2, window_bounds = array<i64: 1, 16, 128>}, {transform_indices = @transform_3, window_bounds = array<i64: 1, 1, 2, 128>}]} {
    %c0 = arith.constant 0 : index
    %c0_0 = arith.constant 0 : index
    %c0_1 = arith.constant 0 : index
    %0 = vector.load %arg2[%c0, %c0_0, %c0_1] : memref<1x16x128xbf16, #tpu.memory_space<vmem>>, vector<1x16x128xbf16>
    %1 = vector.shape_cast %0 : vector<1x16x128xbf16> to vector<16x128xbf16>
    %c0_2 = arith.constant 0 : index
    %c0_3 = arith.constant 0 : index
    %2 = vector.load %arg3[%c0_2, %c0_3] : memref<128x128xbf16, #tpu.memory_space<vmem>>, vector<128x128xbf16>
    %cst = arith.constant dense<0.000000e+00> : vector<16x128xf32>
    %3 = tpu.matmul %1, %2, %cst {dimension_numbers = #tpu.dot_dimension_numbers<[1], [0], [0], [1], [0, 0, 1, 1], [], []>} : vector<16x128xbf16>, vector<128x128xbf16>, vector<16x128xf32> -> vector<16x128xf32>
    %4 = arith.truncf %3 : vector<16x128xf32> to vector<16x128xbf16>
    %c0_4 = arith.constant 0 : index
    %c0_5 = arith.constant 0 : index
    %c0_6 = arith.constant 0 : index
    %5 = vector.load %arg4[%c0_4, %c0_5, %c0_6] : memref<1x16x128xbf16, #tpu.memory_space<vmem>>, vector<1x16x128xbf16>
    %6 = vector.shape_cast %5 : vector<1x16x128xbf16> to vector<16x128xbf16>
    %7 = vector.shape_cast %4 : vector<16x128xbf16> to vector<1x16x128xbf16>
    tpu.vector_store %arg4[%c0_4, %c0_5, %c0_6], %7 {strides = array<i32>} : memref<1x16x128xbf16, #tpu.memory_space<vmem>>, vector<1x16x128xbf16>,
    %cst_7 = arith.constant dense<0.000000e+00> : vector<128xf32>
    %8 = vector.multi_reduction <add>, %3, %cst_7 [0] : vector<16x128xf32> to vector<128xf32>
    %9 = vector.shape_cast %8 : vector<128xf32> to vector<1x128xf32>
    %10 = arith.mulf %3, %3 : vector<16x128xf32>
    %cst_8 = arith.constant dense<0.000000e+00> : vector<128xf32>
    %11 = vector.multi_reduction <add>, %10, %cst_8 [0] : vector<16x128xf32> to vector<128xf32>
    %12 = vector.shape_cast %11 : vector<128xf32> to vector<1x128xf32>
    %13 = tpu.concatenate %9, %12 in 0 : vector<1x128xf32>, vector<1x128xf32> -> vector<2x128xf32>
    %c0_9 = arith.constant 0 : index
    %c0_10 = arith.constant 0 : index
    %c0_11 = arith.constant 0 : index
    %c0_12 = arith.constant 0 : index
    %14 = vector.load %arg5[%c0_9, %c0_10, %c0_11, %c0_12] : memref<1x1x2x128xf32, #tpu.memory_space<vmem>>, vector<1x1x2x128xf32>
    %15 = vector.shape_cast %14 : vector<1x1x2x128xf32> to vector<2x128xf32>
    %16 = vector.shape_cast %13 : vector<2x128xf32> to vector<1x1x2x128xf32>
    tpu.vector_store %arg5[%c0_9, %c0_10, %c0_11, %c0_12], %16 {strides = array<i32>} : memref<1x1x2x128xf32, #tpu.memory_space<vmem>>, vector<1x1x2x128xf32>,
    return
  }
  func.func @transform_0(%arg0: i32, %arg1: i32) -> (i32, i32, i32) {
    %c0_i32 = arith.constant 0 : i32
    %c0_i32_0 = arith.constant 0 : i32
    return %arg0, %arg1, %c0_i32 : i32, i32, i32
  }
  func.func @transform_1(%arg0: i32, %arg1: i32) -> (i32, i32) {
    %c0_i32 = arith.constant 0 : i32
    %c0_i32_0 = arith.constant 0 : i32
    %c0_i32_1 = arith.constant 0 : i32
    return %c0_i32, %c0_i32_0 : i32, i32
  }
  func.func @transform_2(%arg0: i32, %arg1: i32) -> (i32, i32, i32) {
    %c0_i32 = arith.constant 0 : i32
    %c0_i32_0 = arith.constant 0 : i32
    return %arg0, %arg1, %c0_i32 : i32, i32, i32
  }
  func.func @transform_3(%arg0: i32, %arg1: i32) -> (i32, i32, i32, i32) {
    %c0_i32 = arith.constant 0 : i32
    %c0_i32_0 = arith.constant 0 : i32
    %c0_i32_1 = arith.constant 0 : i32
    return %arg0, %arg1, %c0_i32, %c0_i32_0 : i32, i32, i32, i32
  }
}

module attributes {stable_mosaic.version = 11 : i64} {
  func.func @_stage2_kernel(%arg0: i32, %arg1: i32, %arg2: memref<1x16x128xbf16, #tpu.memory_space<vmem>>, %arg3: memref<1x1x1x128xbf16, #tpu.memory_space<vmem>>, %arg4: memref<1x1x1x128xbf16, #tpu.memory_space<vmem>>, %arg5: memref<3x128x128xbf16, #tpu.memory_space<vmem>>, %arg6: memref<1x128xf32, #tpu.memory_space<vmem>>, %arg7: memref<1x128xf32, #tpu.memory_space<vmem>>, %arg8: memref<1x16x128xbf16, #tpu.memory_space<vmem>>, %arg9: memref<1x1x2x128xf32, #tpu.memory_space<vmem>>) attributes {dimension_semantics = [#tpu.dimension_semantics<parallel>, #tpu.dimension_semantics<parallel>], iteration_bounds = array<i64: 2, 1>, scalar_prefetch = 0 : i64, scratch_operands = 0 : i64, tpu.core_type = #tpu.core_type<tc>, window_params = [{transform_indices = @transform_0, window_bounds = array<i64: 1, 16, 128>}, {transform_indices = @transform_1, window_bounds = array<i64: 1, 1, 1, 128>}, {transform_indices = @transform_2, window_bounds = array<i64: 1, 1, 1, 128>}, {pipeline_mode = #tpu.pipeline_mode<synchronous>, transform_indices = @transform_3, window_bounds = array<i64: 3, 128, 128>}, {pipeline_mode = #tpu.pipeline_mode<synchronous>, transform_indices = @transform_4, window_bounds = array<i64: 1, 128>}, {pipeline_mode = #tpu.pipeline_mode<synchronous>, transform_indices = @transform_5, window_bounds = array<i64: 1, 128>}, {transform_indices = @transform_6, window_bounds = array<i64: 1, 16, 128>}, {transform_indices = @transform_7, window_bounds = array<i64: 1, 1, 2, 128>}]} {
    %c0 = arith.constant 0 : index
    %c0_0 = arith.constant 0 : index
    %c0_1 = arith.constant 0 : index
    %0 = vector.load %arg2[%c0, %c0_0, %c0_1] : memref<1x16x128xbf16, #tpu.memory_space<vmem>>, vector<1x16x128xbf16>
    %1 = vector.shape_cast %0 : vector<1x16x128xbf16> to vector<16x128xbf16>
    %2 = arith.extf %1 : vector<16x128xbf16> to vector<16x128xf32>
    %c0_2 = arith.constant 0 : index
    %c0_3 = arith.constant 0 : index
    %3 = vector.load %arg6[%c0_2, %c0_3] : memref<1x128xf32, #tpu.memory_space<vmem>>, vector<1x128xf32>
    %4 = vector.broadcast %3 : vector<1x128xf32> to vector<16x128xf32>
    %5 = arith.mulf %2, %4 : vector<16x128xf32>
    %c0_4 = arith.constant 0 : index
    %c0_5 = arith.constant 0 : index
    %6 = vector.load %arg7[%c0_4, %c0_5] : memref<1x128xf32, #tpu.memory_space<vmem>>, vector<1x128xf32>
    %7 = vector.broadcast %6 : vector<1x128xf32> to vector<16x128xf32>
    %8 = arith.addf %5, %7 : vector<16x128xf32>
    %cst = arith.constant 0.000000e+00 : f32
    %9 = vector.broadcast %cst : f32 to vector<16x128xf32>
    %10 = arith.maximumf %8, %9 : vector<16x128xf32>
    %11 = arith.truncf %10 : vector<16x128xf32> to vector<16x128xbf16>
    %c0_6 = arith.constant 0 : index
    %c0_7 = arith.constant 0 : index
    %c0_8 = arith.constant 0 : index
    %c0_9 = arith.constant 0 : index
    %12 = vector.load %arg3[%c0_6, %c0_7, %c0_8, %c0_9] : memref<1x1x1x128xbf16, #tpu.memory_space<vmem>>, vector<1x1x1x128xbf16>
    %13 = vector.shape_cast %12 : vector<1x1x1x128xbf16> to vector<1x128xbf16>
    %c0_10 = arith.constant 0 : index
    %c0_11 = arith.constant 0 : index
    %c0_12 = arith.constant 0 : index
    %c0_13 = arith.constant 0 : index
    %14 = vector.load %arg4[%c0_10, %c0_11, %c0_12, %c0_13] : memref<1x1x1x128xbf16, #tpu.memory_space<vmem>>, vector<1x1x1x128xbf16>
    %15 = vector.shape_cast %14 : vector<1x1x1x128xbf16> to vector<1x128xbf16>
    %16 = vector.extract_strided_slice %11 {offsets = [0, 0], sizes = [15, 128], strides = [1, 1]} : vector<16x128xbf16> to vector<15x128xbf16>
    %17 = tpu.concatenate %13, %16 in 0 : vector<1x128xbf16>, vector<15x128xbf16> -> vector<16x128xbf16>
    %18 = vector.extract_strided_slice %11 {offsets = [1, 0], sizes = [15, 128], strides = [1, 1]} : vector<16x128xbf16> to vector<15x128xbf16>
    %19 = tpu.concatenate %18, %15 in 0 : vector<15x128xbf16>, vector<1x128xbf16> -> vector<16x128xbf16>
    %c1 = arith.constant 1 : index
    %c0_14 = arith.constant 0 : index
    %c0_15 = arith.constant 0 : index
    %20 = vector.load %arg5[%c1, %c0_14, %c0_15] : memref<3x128x128xbf16, #tpu.memory_space<vmem>>, vector<1x128x128xbf16>
    %21 = vector.shape_cast %20 : vector<1x128x128xbf16> to vector<128x128xbf16>
    %cst_16 = arith.constant dense<0.000000e+00> : vector<16x128xf32>
    %22 = tpu.matmul %11, %21, %cst_16 {dimension_numbers = #tpu.dot_dimension_numbers<[1], [0], [0], [1], [0, 0, 1, 1], [], []>} : vector<16x128xbf16>, vector<128x128xbf16>, vector<16x128xf32> -> vector<16x128xf32>
    %c0_17 = arith.constant 0 : index
    %c0_18 = arith.constant 0 : index
    %c0_19 = arith.constant 0 : index
    %23 = vector.load %arg5[%c0_17, %c0_18, %c0_19] : memref<3x128x128xbf16, #tpu.memory_space<vmem>>, vector<1x128x128xbf16>
    %24 = vector.shape_cast %23 : vector<1x128x128xbf16> to vector<128x128xbf16>
    %cst_20 = arith.constant dense<0.000000e+00> : vector<16x128xf32>
    %25 = tpu.matmul %17, %24, %cst_20 {dimension_numbers = #tpu.dot_dimension_numbers<[1], [0], [0], [1], [0, 0, 1, 1], [], []>} : vector<16x128xbf16>, vector<128x128xbf16>, vector<16x128xf32> -> vector<16x128xf32>
    %26 = arith.addf %22, %25 : vector<16x128xf32>
    %c2 = arith.constant 2 : index
    %c0_21 = arith.constant 0 : index
    %c0_22 = arith.constant 0 : index
    %27 = vector.load %arg5[%c2, %c0_21, %c0_22] : memref<3x128x128xbf16, #tpu.memory_space<vmem>>, vector<1x128x128xbf16>
    %28 = vector.shape_cast %27 : vector<1x128x128xbf16> to vector<128x128xbf16>
    %cst_23 = arith.constant dense<0.000000e+00> : vector<16x128xf32>
    %29 = tpu.matmul %19, %28, %cst_23 {dimension_numbers = #tpu.dot_dimension_numbers<[1], [0], [0], [1], [0, 0, 1, 1], [], []>} : vector<16x128xbf16>, vector<128x128xbf16>, vector<16x128xf32> -> vector<16x128xf32>
    %30 = arith.addf %26, %29 : vector<16x128xf32>
    %31 = arith.truncf %30 : vector<16x128xf32> to vector<16x128xbf16>
    %c0_24 = arith.constant 0 : index
    %c0_25 = arith.constant 0 : index
    %c0_26 = arith.constant 0 : index
    %32 = vector.load %arg8[%c0_24, %c0_25, %c0_26] : memref<1x16x128xbf16, #tpu.memory_space<vmem>>, vector<1x16x128xbf16>
    %33 = vector.shape_cast %32 : vector<1x16x128xbf16> to vector<16x128xbf16>
    %34 = vector.shape_cast %31 : vector<16x128xbf16> to vector<1x16x128xbf16>
    tpu.vector_store %arg8[%c0_24, %c0_25, %c0_26], %34 {strides = array<i32>} : memref<1x16x128xbf16, #tpu.memory_space<vmem>>, vector<1x16x128xbf16>,
    %cst_27 = arith.constant dense<0.000000e+00> : vector<128xf32>
    %35 = vector.multi_reduction <add>, %30, %cst_27 [0] : vector<16x128xf32> to vector<128xf32>
    %36 = vector.shape_cast %35 : vector<128xf32> to vector<1x128xf32>
    %37 = arith.mulf %30, %30 : vector<16x128xf32>
    %cst_28 = arith.constant dense<0.000000e+00> : vector<128xf32>
    %38 = vector.multi_reduction <add>, %37, %cst_28 [0] : vector<16x128xf32> to vector<128xf32>
    %39 = vector.shape_cast %38 : vector<128xf32> to vector<1x128xf32>
    %40 = tpu.concatenate %36, %39 in 0 : vector<1x128xf32>, vector<1x128xf32> -> vector<2x128xf32>
    %c0_29 = arith.constant 0 : index
    %c0_30 = arith.constant 0 : index
    %c0_31 = arith.constant 0 : index
    %c0_32 = arith.constant 0 : index
    %41 = vector.load %arg9[%c0_29, %c0_30, %c0_31, %c0_32] : memref<1x1x2x128xf32, #tpu.memory_space<vmem>>, vector<1x1x2x128xf32>
    %42 = vector.shape_cast %41 : vector<1x1x2x128xf32> to vector<2x128xf32>
    %43 = vector.shape_cast %40 : vector<2x128xf32> to vector<1x1x2x128xf32>
    tpu.vector_store %arg9[%c0_29, %c0_30, %c0_31, %c0_32], %43 {strides = array<i32>} : memref<1x1x2x128xf32, #tpu.memory_space<vmem>>, vector<1x1x2x128xf32>,
    return
  }
  func.func @transform_0(%arg0: i32, %arg1: i32) -> (i32, i32, i32) {
    %c0_i32 = arith.constant 0 : i32
    %c0_i32_0 = arith.constant 0 : i32
    return %arg0, %arg1, %c0_i32 : i32, i32, i32
  }
  func.func @transform_1(%arg0: i32, %arg1: i32) -> (i32, i32, i32, i32) {
    %c0_i32 = arith.constant 0 : i32
    %c0_i32_0 = arith.constant 0 : i32
    %c0_i32_1 = arith.constant 0 : i32
    return %arg0, %arg1, %c0_i32, %c0_i32_0 : i32, i32, i32, i32
  }
  func.func @transform_2(%arg0: i32, %arg1: i32) -> (i32, i32, i32, i32) {
    %c0_i32 = arith.constant 0 : i32
    %c0_i32_0 = arith.constant 0 : i32
    %c0_i32_1 = arith.constant 0 : i32
    return %arg0, %arg1, %c0_i32, %c0_i32_0 : i32, i32, i32, i32
  }
  func.func @transform_3(%arg0: i32, %arg1: i32) -> (i32, i32, i32) {
    %c0_i32 = arith.constant 0 : i32
    %c0_i32_0 = arith.constant 0 : i32
    %c0_i32_1 = arith.constant 0 : i32
    %c0_i32_2 = arith.constant 0 : i32
    return %c0_i32, %c0_i32_0, %c0_i32_1 : i32, i32, i32
  }
  func.func @transform_4(%arg0: i32, %arg1: i32) -> (i32, i32) {
    %c0_i32 = arith.constant 0 : i32
    %c0_i32_0 = arith.constant 0 : i32
    %c0_i32_1 = arith.constant 0 : i32
    return %c0_i32, %c0_i32_0 : i32, i32
  }
  func.func @transform_5(%arg0: i32, %arg1: i32) -> (i32, i32) {
    %c0_i32 = arith.constant 0 : i32
    %c0_i32_0 = arith.constant 0 : i32
    %c0_i32_1 = arith.constant 0 : i32
    return %c0_i32, %c0_i32_0 : i32, i32
  }
  func.func @transform_6(%arg0: i32, %arg1: i32) -> (i32, i32, i32) {
    %c0_i32 = arith.constant 0 : i32
    %c0_i32_0 = arith.constant 0 : i32
    return %arg0, %arg1, %c0_i32 : i32, i32, i32
  }
  func.func @transform_7(%arg0: i32, %arg1: i32) -> (i32, i32, i32, i32) {
    %c0_i32 = arith.constant 0 : i32
    %c0_i32_0 = arith.constant 0 : i32
    %c0_i32_1 = arith.constant 0 : i32
    return %arg0, %arg1, %c0_i32, %c0_i32_0 : i32, i32, i32, i32
  }
}

module attributes {stable_mosaic.version = 11 : i64} {
  func.func @_stage3_kernel(%arg0: i32, %arg1: i32, %arg2: memref<1x16x128xbf16, #tpu.memory_space<vmem>>, %arg3: memref<128x128xbf16, #tpu.memory_space<vmem>>, %arg4: memref<1x128xf32, #tpu.memory_space<vmem>>, %arg5: memref<1x128xf32, #tpu.memory_space<vmem>>, %arg6: memref<1x16x128xbf16, #tpu.memory_space<vmem>>, %arg7: memref<1x1x2x128xf32, #tpu.memory_space<vmem>>) attributes {dimension_semantics = [#tpu.dimension_semantics<parallel>, #tpu.dimension_semantics<parallel>], iteration_bounds = array<i64: 2, 1>, scalar_prefetch = 0 : i64, scratch_operands = 0 : i64, tpu.core_type = #tpu.core_type<tc>, window_params = [{transform_indices = @transform_0, window_bounds = array<i64: 1, 16, 128>}, {pipeline_mode = #tpu.pipeline_mode<synchronous>, transform_indices = @transform_1, window_bounds = array<i64: 128, 128>}, {pipeline_mode = #tpu.pipeline_mode<synchronous>, transform_indices = @transform_2, window_bounds = array<i64: 1, 128>}, {pipeline_mode = #tpu.pipeline_mode<synchronous>, transform_indices = @transform_3, window_bounds = array<i64: 1, 128>}, {transform_indices = @transform_4, window_bounds = array<i64: 1, 16, 128>}, {transform_indices = @transform_5, window_bounds = array<i64: 1, 1, 2, 128>}]} {
    %c0 = arith.constant 0 : index
    %c0_0 = arith.constant 0 : index
    %c0_1 = arith.constant 0 : index
    %0 = vector.load %arg2[%c0, %c0_0, %c0_1] : memref<1x16x128xbf16, #tpu.memory_space<vmem>>, vector<1x16x128xbf16>
    %1 = vector.shape_cast %0 : vector<1x16x128xbf16> to vector<16x128xbf16>
    %2 = arith.extf %1 : vector<16x128xbf16> to vector<16x128xf32>
    %c0_2 = arith.constant 0 : index
    %c0_3 = arith.constant 0 : index
    %3 = vector.load %arg4[%c0_2, %c0_3] : memref<1x128xf32, #tpu.memory_space<vmem>>, vector<1x128xf32>
    %4 = vector.broadcast %3 : vector<1x128xf32> to vector<16x128xf32>
    %5 = arith.mulf %2, %4 : vector<16x128xf32>
    %c0_4 = arith.constant 0 : index
    %c0_5 = arith.constant 0 : index
    %6 = vector.load %arg5[%c0_4, %c0_5] : memref<1x128xf32, #tpu.memory_space<vmem>>, vector<1x128xf32>
    %7 = vector.broadcast %6 : vector<1x128xf32> to vector<16x128xf32>
    %8 = arith.addf %5, %7 : vector<16x128xf32>
    %cst = arith.constant 0.000000e+00 : f32
    %9 = vector.broadcast %cst : f32 to vector<16x128xf32>
    %10 = arith.maximumf %8, %9 : vector<16x128xf32>
    %11 = arith.truncf %10 : vector<16x128xf32> to vector<16x128xbf16>
    %c0_6 = arith.constant 0 : index
    %c0_7 = arith.constant 0 : index
    %12 = vector.load %arg3[%c0_6, %c0_7] : memref<128x128xbf16, #tpu.memory_space<vmem>>, vector<128x128xbf16>
    %cst_8 = arith.constant dense<0.000000e+00> : vector<16x128xf32>
    %13 = tpu.matmul %11, %12, %cst_8 {dimension_numbers = #tpu.dot_dimension_numbers<[1], [0], [0], [1], [0, 0, 1, 1], [], []>} : vector<16x128xbf16>, vector<128x128xbf16>, vector<16x128xf32> -> vector<16x128xf32>
    %14 = arith.truncf %13 : vector<16x128xf32> to vector<16x128xbf16>
    %c0_9 = arith.constant 0 : index
    %c0_10 = arith.constant 0 : index
    %c0_11 = arith.constant 0 : index
    %15 = vector.load %arg6[%c0_9, %c0_10, %c0_11] : memref<1x16x128xbf16, #tpu.memory_space<vmem>>, vector<1x16x128xbf16>
    %16 = vector.shape_cast %15 : vector<1x16x128xbf16> to vector<16x128xbf16>
    %17 = vector.shape_cast %14 : vector<16x128xbf16> to vector<1x16x128xbf16>
    tpu.vector_store %arg6[%c0_9, %c0_10, %c0_11], %17 {strides = array<i32>} : memref<1x16x128xbf16, #tpu.memory_space<vmem>>, vector<1x16x128xbf16>,
    %cst_12 = arith.constant dense<0.000000e+00> : vector<128xf32>
    %18 = vector.multi_reduction <add>, %13, %cst_12 [0] : vector<16x128xf32> to vector<128xf32>
    %19 = vector.shape_cast %18 : vector<128xf32> to vector<1x128xf32>
    %20 = arith.mulf %13, %13 : vector<16x128xf32>
    %cst_13 = arith.constant dense<0.000000e+00> : vector<128xf32>
    %21 = vector.multi_reduction <add>, %20, %cst_13 [0] : vector<16x128xf32> to vector<128xf32>
    %22 = vector.shape_cast %21 : vector<128xf32> to vector<1x128xf32>
    %23 = tpu.concatenate %19, %22 in 0 : vector<1x128xf32>, vector<1x128xf32> -> vector<2x128xf32>
    %c0_14 = arith.constant 0 : index
    %c0_15 = arith.constant 0 : index
    %c0_16 = arith.constant 0 : index
    %c0_17 = arith.constant 0 : index
    %24 = vector.load %arg7[%c0_14, %c0_15, %c0_16, %c0_17] : memref<1x1x2x128xf32, #tpu.memory_space<vmem>>, vector<1x1x2x128xf32>
    %25 = vector.shape_cast %24 : vector<1x1x2x128xf32> to vector<2x128xf32>
    %26 = vector.shape_cast %23 : vector<2x128xf32> to vector<1x1x2x128xf32>
    tpu.vector_store %arg7[%c0_14, %c0_15, %c0_16, %c0_17], %26 {strides = array<i32>} : memref<1x1x2x128xf32, #tpu.memory_space<vmem>>, vector<1x1x2x128xf32>,
    return
  }
  func.func @transform_0(%arg0: i32, %arg1: i32) -> (i32, i32, i32) {
    %c0_i32 = arith.constant 0 : i32
    %c0_i32_0 = arith.constant 0 : i32
    return %arg0, %arg1, %c0_i32 : i32, i32, i32
  }
  func.func @transform_1(%arg0: i32, %arg1: i32) -> (i32, i32) {
    %c0_i32 = arith.constant 0 : i32
    %c0_i32_0 = arith.constant 0 : i32
    %c0_i32_1 = arith.constant 0 : i32
    return %c0_i32, %c0_i32_0 : i32, i32
  }
  func.func @transform_2(%arg0: i32, %arg1: i32) -> (i32, i32) {
    %c0_i32 = arith.constant 0 : i32
    %c0_i32_0 = arith.constant 0 : i32
    %c0_i32_1 = arith.constant 0 : i32
    return %c0_i32, %c0_i32_0 : i32, i32
  }
  func.func @transform_3(%arg0: i32, %arg1: i32) -> (i32, i32) {
    %c0_i32 = arith.constant 0 : i32
    %c0_i32_0 = arith.constant 0 : i32
    %c0_i32_1 = arith.constant 0 : i32
    return %c0_i32, %c0_i32_0 : i32, i32
  }
  func.func @transform_4(%arg0: i32, %arg1: i32) -> (i32, i32, i32) {
    %c0_i32 = arith.constant 0 : i32
    %c0_i32_0 = arith.constant 0 : i32
    return %arg0, %arg1, %c0_i32 : i32, i32, i32
  }
  func.func @transform_5(%arg0: i32, %arg1: i32) -> (i32, i32, i32, i32) {
    %c0_i32 = arith.constant 0 : i32
    %c0_i32_0 = arith.constant 0 : i32
    %c0_i32_1 = arith.constant 0 : i32
    return %arg0, %arg1, %c0_i32, %c0_i32_0 : i32, i32, i32, i32
  }
}

module attributes {stable_mosaic.version = 11 : i64} {
  func.func @_stage4_kernel(%arg0: i32, %arg1: i32, %arg2: memref<1x16x128xbf16, #tpu.memory_space<vmem>>, %arg3: memref<1x16x128xbf16, #tpu.memory_space<vmem>>, %arg4: memref<1x128xf32, #tpu.memory_space<vmem>>, %arg5: memref<1x128xf32, #tpu.memory_space<vmem>>, %arg6: memref<1x16x128xf32, #tpu.memory_space<vmem>>) attributes {dimension_semantics = [#tpu.dimension_semantics<parallel>, #tpu.dimension_semantics<parallel>], iteration_bounds = array<i64: 2, 1>, scalar_prefetch = 0 : i64, scratch_operands = 0 : i64, tpu.core_type = #tpu.core_type<tc>, window_params = [{transform_indices = @transform_0, window_bounds = array<i64: 1, 16, 128>}, {transform_indices = @transform_1, window_bounds = array<i64: 1, 16, 128>}, {pipeline_mode = #tpu.pipeline_mode<synchronous>, transform_indices = @transform_2, window_bounds = array<i64: 1, 128>}, {pipeline_mode = #tpu.pipeline_mode<synchronous>, transform_indices = @transform_3, window_bounds = array<i64: 1, 128>}, {transform_indices = @transform_4, window_bounds = array<i64: 1, 16, 128>}]} {
    %c0 = arith.constant 0 : index
    %c0_0 = arith.constant 0 : index
    %c0_1 = arith.constant 0 : index
    %0 = vector.load %arg2[%c0, %c0_0, %c0_1] : memref<1x16x128xbf16, #tpu.memory_space<vmem>>, vector<1x16x128xbf16>
    %1 = vector.shape_cast %0 : vector<1x16x128xbf16> to vector<16x128xbf16>
    %2 = arith.extf %1 : vector<16x128xbf16> to vector<16x128xf32>
    %c0_2 = arith.constant 0 : index
    %c0_3 = arith.constant 0 : index
    %3 = vector.load %arg4[%c0_2, %c0_3] : memref<1x128xf32, #tpu.memory_space<vmem>>, vector<1x128xf32>
    %4 = vector.broadcast %3 : vector<1x128xf32> to vector<16x128xf32>
    %5 = arith.mulf %2, %4 : vector<16x128xf32>
    %c0_4 = arith.constant 0 : index
    %c0_5 = arith.constant 0 : index
    %6 = vector.load %arg5[%c0_4, %c0_5] : memref<1x128xf32, #tpu.memory_space<vmem>>, vector<1x128xf32>
    %7 = vector.broadcast %6 : vector<1x128xf32> to vector<16x128xf32>
    %8 = arith.addf %5, %7 : vector<16x128xf32>
    %c0_6 = arith.constant 0 : index
    %c0_7 = arith.constant 0 : index
    %c0_8 = arith.constant 0 : index
    %9 = vector.load %arg3[%c0_6, %c0_7, %c0_8] : memref<1x16x128xbf16, #tpu.memory_space<vmem>>, vector<1x16x128xbf16>
    %10 = vector.shape_cast %9 : vector<1x16x128xbf16> to vector<16x128xbf16>
    %11 = arith.extf %10 : vector<16x128xbf16> to vector<16x128xf32>
    %12 = arith.addf %8, %11 : vector<16x128xf32>
    %cst = arith.constant 0.000000e+00 : f32
    %13 = vector.broadcast %cst : f32 to vector<16x128xf32>
    %14 = arith.maximumf %12, %13 : vector<16x128xf32>
    %c0_9 = arith.constant 0 : index
    %c0_10 = arith.constant 0 : index
    %c0_11 = arith.constant 0 : index
    %15 = vector.load %arg6[%c0_9, %c0_10, %c0_11] : memref<1x16x128xf32, #tpu.memory_space<vmem>>, vector<1x16x128xf32>
    %16 = vector.shape_cast %15 : vector<1x16x128xf32> to vector<16x128xf32>
    %17 = vector.shape_cast %14 : vector<16x128xf32> to vector<1x16x128xf32>
    tpu.vector_store %arg6[%c0_9, %c0_10, %c0_11], %17 {strides = array<i32>} : memref<1x16x128xf32, #tpu.memory_space<vmem>>, vector<1x16x128xf32>,
    return
  }
  func.func @transform_0(%arg0: i32, %arg1: i32) -> (i32, i32, i32) {
    %c0_i32 = arith.constant 0 : i32
    %c0_i32_0 = arith.constant 0 : i32
    return %arg0, %arg1, %c0_i32 : i32, i32, i32
  }
  func.func @transform_1(%arg0: i32, %arg1: i32) -> (i32, i32, i32) {
    %c0_i32 = arith.constant 0 : i32
    %c0_i32_0 = arith.constant 0 : i32
    return %arg0, %arg1, %c0_i32 : i32, i32, i32
  }
  func.func @transform_2(%arg0: i32, %arg1: i32) -> (i32, i32) {
    %c0_i32 = arith.constant 0 : i32
    %c0_i32_0 = arith.constant 0 : i32
    %c0_i32_1 = arith.constant 0 : i32
    return %c0_i32, %c0_i32_0 : i32, i32
  }
  func.func @transform_3(%arg0: i32, %arg1: i32) -> (i32, i32) {
    %c0_i32 = arith.constant 0 : i32
    %c0_i32_0 = arith.constant 0 : i32
    %c0_i32_1 = arith.constant 0 : i32
    return %c0_i32, %c0_i32_0 : i32, i32
  }
  func.func @transform_4(%arg0: i32, %arg1: i32) -> (i32, i32, i32) {
    %c0_i32 = arith.constant 0 : i32
    %c0_i32_0 = arith.constant 0 : i32
    return %arg0, %arg1, %c0_i32 : i32, i32, i32
  }
}

</mosaic_0001>

<bundles_post_ra>
// kernel: bottleneck_forward.7
= control target key start
LH: loop header
LB: loop body
LE: loop exit
PB: predicated region body
PF: predicated region fallthrough
CT: control target
= control target key end

     0   :  { %s509_s15 = smov 0   ;;  %s511_s16 = smov 0   ;;  %s551_s0 = inlined_call_operand.vmem [shape: bf16[2,16,128], index: 0, kind: input, shape index: {}]   ;;  %s552_s1 = inlined_call_operand.vmem [shape: bf16[2,16,128], index: 1, kind: input, shape index: {}]   ;;  %s553_s2 = inlined_call_operand.vmem [shape: f32[1,128], index: 2, kind: input, shape index: {}]   ;;  %s554_s3 = inlined_call_operand.vmem [shape: f32[1,128], index: 3, kind: input, shape index: {}]   ;;  %s555_s4 = inlined_call_operand.vmem [shape: f32[2,16,128], index: 4, kind: output, shape index: {}]  }
   0x1   :  { %s513_s17 = smov 0  }
   0x2 LB: > { %s26_s18 = sadd.s32 1, %s478_s16  ;;  %p414_p0 = scmp.ge.s32.totalorder %s482_s17, 1  ;;  %s482_s17 = sphi %s513_s17, %s14_s17   ;;  %s478_s16 = sphi %s511_s16, %s557_s16   ;;  %s474_s15 = sphi %s509_s15, %s556_s15  }
   0x3   : > { %p28_p1 = scmp.ge.s32.totalorder %s26_s18, 2  ;;  %p200_p2 = scmp.lt.s32.totalorder %s482_s17, 3 }
   0x5   : > { %s559_s18 = smov (%p28_p1, %s26_s18), 0  ;;  %p201_p3 = pnand %p414_p0, %p200_p2 }
   0x6   : > { %p244_p4 = scmp.lt.s32.totalorder (!%p201_p3), %s474_s15, 1  ;;  %v421_v1 = vld [vmem:[%s553_s2] ss:$0 sm:$0xff] (!%p201_p3) }
   0x7   : > { %204 = sbr.rel (%p201_p3) target bundleno = 29 (0x1d), region = 36  ;;  %v422_v5 = vld [vmem:[%s554_s3] ss:$0 sm:$0xff] (!%p201_p3) }
   0xe   : > { %s561_s15 = smov (!%p244_p4, %s474_s15), 1 }
   0xf   : > { %s425_s19 = sshll.u32 %s561_s15, 3  ;;  %s427_s30 = sshll.u32 %s561_s15, 4 }
  0x10   : > { %s251_s22 = scalar_lea.vmem %s551_s0, %s425_s19  ;;  %s261_s25 = scalar_lea.vmem %s552_s1, %s425_s19 }
  0x11   : > { %v429_v0 = vld [vmem:[%s251_s22] sm:$0xff]   ;;  %s271_s7 = scalar_lea.vmem %s555_s4, %s427_s30 }
  0x12   : > { %v433_v2 = vld [vmem:[%s261_s25] sm:$0xff]   ;;  %v430_v3 = vunpack.c.l.bf16 %v429_v0  ;;  %v431_v4 = vunpack.c.h.bf16 %v429_v0 }
  0x13   : > { %v434_v7 = vunpack.c.l.bf16 %v433_v2  ;;  %v435_v9 = vunpack.c.h.bf16 %v433_v2 }
  0x14   : > { %v284_v6 = vmul.f32 %v430_v3, %v421_v1  ;;  %v285_v8 = vmul.f32 %v431_v4, %v421_v1 }
  0x16   : > { %v293_v10 = vadd.f32 %v422_v5, %v284_v6  ;;  %v294_v11 = vadd.f32 %v422_v5, %v285_v8 }
  0x18   : > { %v299_v12 = vadd.f32 %v434_v7, %v293_v10  ;;  %v300_v13 = vadd.f32 %v435_v9, %v294_v11 }
  0x1a   : > { %v301_v14 = vmax.f32 %v299_v12, 0.0  ;;  %v302_v15 = vmax.f32 %v300_v13, 0.0 }
  0x1c   : > { %303 = vst [vmem:[%s271_s7] sm:$0xff] %v301_v14  ;;  %304 = vst [vmem:[%s271_s7 + $0x8] sm:$0xff] %v302_v15 }
  0x1d PF: > { %s14_s17 = sadd.s32 1, %s482_s17   ;;  %s556_s15 = smov %s478_s16 }
  0x1e   : > { %p11_p5 = scmp.ge.s32.totalorder %s14_s17, 4   ;;  %s557_s16 = smov %s559_s18 }
  0x20   :  { %13 = sbr.rel (!%p11_p5) target bundleno = 2 (0x2), region = 69 }

// kernel: bottleneck_forward.6
= control target key start
LH: loop header
LB: loop body
LE: loop exit
PB: predicated region body
PF: predicated region fallthrough
CT: control target
= control target key end

     0   :  { %s727_s18 = smov 0   ;;  %s729_s19 = smov 0   ;;  %s801_s0 = inlined_call_operand.vmem [shape: bf16[2,16,128], index: 0, kind: input, shape index: {}]   ;;  %s802_s1 = inlined_call_operand.vmem [shape: bf16[128,128], index: 1, kind: input, shape index: {}]   ;;  %s803_s2 = inlined_call_operand.vmem [shape: f32[1,128], index: 2, kind: input, shape index: {}]   ;;  %s804_s3 = inlined_call_operand.vmem [shape: f32[1,128], index: 3, kind: input, shape index: {}]   ;;  %s805_s4 = inlined_call_operand.vmem [shape: bf16[2,16,128], index: 4, kind: output, shape index: {0}]   ;;  %s806_s5 = inlined_call_operand.vmem [shape: f32[2,1,2,128], index: 5, kind: output, shape index: {1}]  }
   0x1   :  { %s731_s20 = smov 0  }
   0x2 LB: > { %s28_s21 = sadd.s32 1, %s689_s19  ;;  %p575_p0 = scmp.ge.s32.totalorder %s693_s20, 1  ;;  %s693_s20 = sphi %s731_s20, %s16_s20   ;;  %s689_s19 = sphi %s729_s19, %s808_s19   ;;  %s685_s18 = sphi %s727_s18, %s807_s18  }
   0x3   : > { %p30_p1 = scmp.ge.s32.totalorder %s28_s21, 2  ;;  %p213_p2 = scmp.lt.s32.totalorder %s693_s20, 3 }
   0x5   : > { %s810_s21 = smov (%p30_p1, %s28_s21), 0  ;;  %p214_p3 = pnand %p575_p0, %p213_p2 }
   0x6   : > { %v663_v0 = vld [vmem:[%s802_s1] sm:$0xff] (!%p214_p3)   ;;  %v695_v1 = vmov (!%p214_p3), 0.0   ;;  %v664_v2 = vld [vmem:[%s802_s1 + $0x8] sm:$0xff] (!%p214_p3)   ;;  %vm696_vm0 = vmmov (!%p214_p3), 0   ;;  %p257_p4 = scmp.lt.s32.totalorder (!%p214_p3), %s685_s18, 1  ;;  %v665_v3 = vld [vmem:[%s802_s1 + $0x10] sm:$0xff] (!%p214_p3)  }
   0x7   : > { %217 = sbr.rel (%p214_p3) target bundleno = 271 (0x10f), region = 36  ;;  %617 = vmatprep.subr.bf16.mxu0 (!%p214_p3), %v695_v1  ;;  %633 = vmatprep.mubr.msk.bf16.mxu0 (!%p214_p3), %vm696_vm0, %v695_v1  ;;  %v666_v4 = vld [vmem:[%s802_s1 + $0x18] sm:$0xff] (!%p214_p3)   ;;  %v667_v8 = vld [vmem:[%s802_s1 + $0x20] sm:$0xff] (!%p214_p3)   ;;  %v668_v12 = vld [vmem:[%s802_s1 + $0x28] sm:$0xff] (!%p214_p3)   ;;  %vm440_vm1 = vcmask (!%p214_p3), 1040384  }
   0x8   : > { %618 = vmatpush3.bf16.msra.mxu0 (!%p214_p3), %v663_v0  ;;  %v581_v9 = vld [vmem:[%s803_s2] ss:$0 sm:$0xff] (!%p214_p3)  ;;  %v669_v16 = vld [vmem:[%s802_s1 + $0x30] sm:$0xff] (!%p214_p3)   ;;  %v670_v19 = vld [vmem:[%s802_s1 + $0x38] sm:$0xff] (!%p214_p3)  }
   0x9   : > { %619 = vmatprep.subr.bf16.mxu0 (!%p214_p3), %v695_v1  ;;  %v582_v13 = vld [vmem:[%s804_s3] ss:$0 sm:$0xff] (!%p214_p3) }
   0xc   : > { %620 = vmatpush3.bf16.msra.mxu0 (!%p214_p3), %v664_v2 }
   0xd   : > { %621 = vmatprep.subr.bf16.mxu0 (!%p214_p3), %v695_v1 }
   0xe   : > { %s812_s18 = smov (!%p257_p4, %s685_s18), 1 }
   0xf   : > { %s595_s28 = sshll.u32 %s812_s18, 3  ;;  %s580_s29 = sshll.u32 %s812_s18, 1 }
  0x10   : > { %s264_s6 = scalar_lea.vmem %s801_s0, %s595_s28  ;;  %622 = vmatpush3.bf16.msra.mxu0 %v665_v3  ;;  %s274_s27 = scalar_lea.vmem %s805_s4, %s595_s28 }
  0x11   : > { %v600_v5 = vld [vmem:[%s264_s6] sm:$0xff]   ;;  %623 = vmatprep.subr.bf16.mxu0 %v695_v1  ;;  %s282_s6 = scalar_lea.vmem %s806_s5, %s580_s29 }
  0x12   : > { %v601_v6 = vunpack.c.l.bf16 %v600_v5  ;;  %v602_v7 = vunpack.c.h.bf16 %v600_v5 }
  0x14   : > { %624 = vmatpush3.bf16.msra.mxu0 %v666_v4  ;;  %v295_v10 = vmul.f32 %v601_v6, %v581_v9  ;;  %v296_v11 = vmul.f32 %v602_v7, %v581_v9 }
  0x15   : > { %625 = vmatprep.subr.bf16.mxu0 %v695_v1 }
  0x16   : > { %v304_v14 = vadd.f32 %v582_v13, %v295_v10  ;;  %v305_v15 = vadd.f32 %v582_v13, %v296_v11 }
  0x18   : > { %626 = vmatpush3.bf16.msra.mxu0 %v667_v8  ;;  %v306_v17 = vmax.f32 %v304_v14, 0.0  ;;  %v307_v18 = vmax.f32 %v305_v15, 0.0 }
  0x19   : > { %627 = vmatprep.subr.bf16.mxu0 %v695_v1 }
  0x1a   : > { %v308_v20 = vpack.c.bf16 %v307_v18, %v306_v17 }
  0x1c   : > { %628 = vmatpush3.bf16.msra.mxu0 %v668_v12 }
  0x1d   : > { %629 = vmatprep.subr.bf16.mxu0 %v695_v1 }
  0x20   : > { %630 = vmatpush3.bf16.msra.mxu0 %v669_v16 }
  0x21   : > { %631 = vmatprep.subr.bf16.mxu0 %v695_v1 }
  0x24   : > { %632 = vmatpush3.bf16.msra.mxu0 %v670_v19 }
  0x27   : > { %634 = vmatmul.mubr.bf16.vlgmr.msra.gmra.mrb[0].mxu0 %v308_v20 }
  0xfa   : > { %v407_v21 = vpop.f32.mrb[0].mxu0 }
  0xfb   : > { %v635_v22 = vpop.f32.mrb[1].mxu0  ;;  %v431_v24 = vmul.f32 %v407_v21, %v407_v21 }
  0xfc   : > { %v410_v23 = vpop.f32.mrb[2].mxu0 }
  0xfd   : > { %v606_v25 = vpack.c.bf16 %v410_v23, %v407_v21  ;;  %v424_v26 = vadd.f32 %v410_v23, %v407_v21  ;;  %v432_v27 = vmul.f32 %v410_v23, %v410_v23  ;;  %v636_v28 = vpop.f32.mrb[3].mxu0 }
  0xff   : > { %607 = vst [vmem:[%s274_s27] sm:$0xff] %v606_v25   ;;  %v425_v29 = vrot.slane %v424_v26, 4  ;;  %v433_v30 = vadd.f32 %v432_v27, %v431_v24 }
 0x101   : > { %v426_v31 = vadd.f32 %v425_v29, %v424_v26  ;;  %v434_v32 = vrot.slane %v433_v30, 4 }
 0x103   : > { %v427_v33 = vrot.slane %v426_v31, 2  ;;  %v435_v34 = vadd.f32 %v434_v32, %v433_v30 }
 0x105   : > { %v428_v35 = vadd.f32 %v427_v33, %v426_v31  ;;  %v436_v36 = vrot.slane %v435_v34, 2 }
 0x107   : > { %v429_v37 = vrot.slane %v428_v35, 1  ;;  %v437_v38 = vadd.f32 %v436_v36, %v435_v34 }
 0x109   : > { %v438_v39 = vrot.slane %v437_v38, 1  ;;  %v430_v40 = vadd.f32 %v429_v37, %v428_v35 }
 0x10b   : > { %v439_v41 = vadd.f32 %v438_v39, %v437_v38 }
 0x10d   : > { %v441_v42 = vsel %vm440_vm1, %v430_v40, %v439_v41 }
 0x10e   : > { %442 = vst [vmem:[%s282_s6] sm:$0x3] %v441_v42 }
 0x10f PF: > { %s16_s20 = sadd.s32 1, %s693_s20   ;;  %s807_s18 = smov %s689_s19 }
 0x110   : > { %p13_p5 = scmp.ge.s32.totalorder %s16_s20, 4   ;;  %s808_s19 = smov %s810_s21 }
 0x112   :  { %15 = sbr.rel (!%p13_p5) target bundleno = 2 (0x2), region = 78 }

// kernel: bottleneck_forward.4
= control target key start
LH: loop header
LB: loop body
LE: loop exit
PB: predicated region body
PF: predicated region fallthrough
CT: control target
= control target key end

     0   :  { %s642_s12 = smov 0   ;;  %s644_s13 = smov 0   ;;  %s706_s0 = inlined_call_operand.vmem [shape: bf16[2,16,128], index: 0, kind: input, shape index: {}]   ;;  %s707_s1 = inlined_call_operand.vmem [shape: bf16[128,128], index: 1, kind: input, shape index: {}]   ;;  %s708_s2 = inlined_call_operand.vmem [shape: bf16[2,16,128], index: 2, kind: output, shape index: {0}]   ;;  %s709_s3 = inlined_call_operand.vmem [shape: f32[2,1,2,128], index: 3, kind: output, shape index: {1}]  }
   0x1   :  { %s646_s14 = smov 0  }
   0x2 LB: > { %s26_s15 = sadd.s32 1, %s614_s13  ;;  %p504_p0 = scmp.ge.s32.totalorder %s618_s14, 1  ;;  %s618_s14 = sphi %s646_s14, %s14_s14   ;;  %s614_s13 = sphi %s644_s13, %s711_s13   ;;  %s610_s12 = sphi %s642_s12, %s710_s12  }
   0x3   : > { %p28_p1 = scmp.ge.s32.totalorder %s26_s15, 2  ;;  %p163_p2 = scmp.lt.s32.totalorder %s618_s14, 3 }
   0x5   : > { %s713_s15 = smov (%p28_p1, %s26_s15), 0  ;;  %p164_p3 = pnand %p504_p0, %p163_p2 }
   0x6   : > { %v587_v0 = vld [vmem:[%s707_s1] sm:$0xff] (!%p164_p3)   ;;  %v620_v1 = vmov (!%p164_p3), 0.0   ;;  %v588_v2 = vld [vmem:[%s707_s1 + $0x8] sm:$0xff] (!%p164_p3)   ;;  %vm621_vm0 = vmmov (!%p164_p3), 0   ;;  %p203_p4 = scmp.lt.s32.totalorder (!%p164_p3), %s610_s12, 1  ;;  %v589_v3 = vld [vmem:[%s707_s1 + $0x10] sm:$0xff] (!%p164_p3)  }
   0x7   : > { %167 = sbr.rel (%p164_p3) target bundleno = 271 (0x10f), region = 28  ;;  %541 = vmatprep.subr.bf16.mxu0 (!%p164_p3), %v620_v1  ;;  %557 = vmatprep.mubr.msk.bf16.mxu0 (!%p164_p3), %vm621_vm0, %v620_v1  ;;  %v590_v4 = vld [vmem:[%s707_s1 + $0x18] sm:$0xff] (!%p164_p3)   ;;  %v591_v5 = vld [vmem:[%s707_s1 + $0x20] sm:$0xff] (!%p164_p3)   ;;  %v592_v6 = vld [vmem:[%s707_s1 + $0x28] sm:$0xff] (!%p164_p3)   ;;  %vm369_vm1 = vcmask (!%p164_p3), 1040384  }
   0x8   : > { %542 = vmatpush3.bf16.msra.mxu0 (!%p164_p3), %v587_v0  ;;  %v593_v7 = vld [vmem:[%s707_s1 + $0x30] sm:$0xff] (!%p164_p3)   ;;  %v594_v8 = vld [vmem:[%s707_s1 + $0x38] sm:$0xff] (!%p164_p3)  }
   0x9   : > { %543 = vmatprep.subr.bf16.mxu0 (!%p164_p3), %v620_v1 }
   0xc   : > { %544 = vmatpush3.bf16.msra.mxu0 (!%p164_p3), %v588_v2 }
   0xd   : > { %545 = vmatprep.subr.bf16.mxu0 (!%p164_p3), %v620_v1 }
   0xe   : > { %s715_s12 = smov (!%p203_p4, %s610_s12), 1 }
   0xf   : > { %s523_s22 = sshll.u32 %s715_s12, 3  ;;  %s509_s16 = sshll.u32 %s715_s12, 1 }
  0x10   : > { %s210_s25 = scalar_lea.vmem %s706_s0, %s523_s22  ;;  %546 = vmatpush3.bf16.msra.mxu0 %v589_v3  ;;  %s220_s11 = scalar_lea.vmem %s708_s2, %s523_s22 }
  0x11   : > { %547 = vmatprep.subr.bf16.mxu0 %v620_v1  ;;  %v595_v9 = vld [vmem:[%s210_s25] sm:$0xff]   ;;  %s228_s19 = scalar_lea.vmem %s709_s3, %s509_s16 }
  0x14   : > { %548 = vmatpush3.bf16.msra.mxu0 %v590_v4 }
  0x15   : > { %549 = vmatprep.subr.bf16.mxu0 %v620_v1 }
  0x18   : > { %550 = vmatpush3.bf16.msra.mxu0 %v591_v5 }
  0x19   : > { %551 = vmatprep.subr.bf16.mxu0 %v620_v1 }
  0x1c   : > { %552 = vmatpush3.bf16.msra.mxu0 %v592_v6 }
  0x1d   : > { %553 = vmatprep.subr.bf16.mxu0 %v620_v1 }
  0x20   : > { %554 = vmatpush3.bf16.msra.mxu0 %v593_v7 }
  0x21   : > { %555 = vmatprep.subr.bf16.mxu0 %v620_v1 }
  0x24   : > { %556 = vmatpush3.bf16.msra.mxu0 %v594_v8 }
  0x27   : > { %558 = vmatmul.mubr.bf16.vlgmr.msra.gmra.mrb[0].mxu0 %v595_v9 }
  0xfa   : > { %v336_v10 = vpop.f32.mrb[0].mxu0 }
  0xfb   : > { %v559_v11 = vpop.f32.mrb[1].mxu0  ;;  %v360_v13 = vmul.f32 %v336_v10, %v336_v10 }
  0xfc   : > { %v339_v12 = vpop.f32.mrb[2].mxu0 }
  0xfd   : > { %v530_v14 = vpack.c.bf16 %v339_v12, %v336_v10  ;;  %v353_v15 = vadd.f32 %v339_v12, %v336_v10  ;;  %v361_v16 = vmul.f32 %v339_v12, %v339_v12  ;;  %v560_v17 = vpop.f32.mrb[3].mxu0 }
  0xff   : > { %531 = vst [vmem:[%s220_s11] sm:$0xff] %v530_v14   ;;  %v354_v18 = vrot.slane %v353_v15, 4  ;;  %v362_v19 = vadd.f32 %v361_v16, %v360_v13 }
 0x101   : > { %v355_v20 = vadd.f32 %v354_v18, %v353_v15  ;;  %v363_v21 = vrot.slane %v362_v19, 4 }
 0x103   : > { %v356_v22 = vrot.slane %v355_v20, 2  ;;  %v364_v23 = vadd.f32 %v363_v21, %v362_v19 }
 0x105   : > { %v357_v24 = vadd.f32 %v356_v22, %v355_v20  ;;  %v365_v25 = vrot.slane %v364_v23, 2 }
 0x107   : > { %v358_v26 = vrot.slane %v357_v24, 1  ;;  %v366_v27 = vadd.f32 %v365_v25, %v364_v23 }
 0x109   : > { %v367_v28 = vrot.slane %v366_v27, 1  ;;  %v359_v29 = vadd.f32 %v358_v26, %v357_v24 }
 0x10b   : > { %v368_v30 = vadd.f32 %v367_v28, %v366_v27 }
 0x10d   : > { %v370_v31 = vsel %vm369_vm1, %v359_v29, %v368_v30 }
 0x10e   : > { %371 = vst [vmem:[%s228_s19] sm:$0x3] %v370_v31 }
 0x10f PF: > { %s14_s14 = sadd.s32 1, %s618_s14   ;;  %s710_s12 = smov %s614_s13 }
 0x110   : > { %p11_p5 = scmp.ge.s32.totalorder %s14_s14, 4   ;;  %s711_s13 = smov %s713_s15 }
 0x112   :  { %13 = sbr.rel (!%p11_p5) target bundleno = 2 (0x2), region = 70 }

// kernel: bottleneck_forward.5
= control target key start
LH: loop header
LB: loop body
LE: loop exit
PB: predicated region body
PF: predicated region fallthrough
CT: control target
= control target key end

     0   :  { %s1251_s24 = smov 0   ;;  %s1253_s25 = smov 0   ;;  %s1418_s0 = inlined_call_operand.vmem [shape: bf16[2,16,128], index: 0, kind: input, shape index: {}]   ;;  %s1419_s1 = inlined_call_operand.vmem [shape: bf16[2,1,1,128], index: 1, kind: input, shape index: {}, may-alias: {1,2}]   ;;  %s1420_s2 = inlined_call_operand.vmem [shape: bf16[2,1,1,128], index: 2, kind: input, shape index: {}, may-alias: {1,2}]   ;;  %s1421_s3 = inlined_call_operand.vmem [shape: bf16[3,128,128], index: 3, kind: input, shape index: {}]   ;;  %s1422_s4 = inlined_call_operand.vmem [shape: f32[1,128], index: 4, kind: input, shape index: {}]   ;;  %s1423_s5 = inlined_call_operand.vmem [shape: f32[1,128], index: 5, kind: input, shape index: {}]   ;;  %s1424_s6 = inlined_call_operand.vmem [shape: bf16[2,16,128], index: 6, kind: output, shape index: {0}]   ;;  %s1425_s7 = inlined_call_operand.vmem [shape: f32[2,1,2,128], index: 7, kind: output, shape index: {1}]  }
   0x1   :  { %s1255_s26 = smov 0  }
   0x2 LB: > { %s30_s27 = sadd.s32 1, %s1202_s25  ;;  %p958_p0 = scmp.ge.s32.totalorder %s1206_s26, 1  ;;  %s1206_s26 = sphi %s1255_s26, %s18_s26   ;;  %s1202_s25 = sphi %s1253_s25, %s1427_s25   ;;  %s1198_s24 = sphi %s1251_s24, %s1426_s24  }
   0x3   : > { %p32_p1 = scmp.ge.s32.totalorder %s30_s27, 2  ;;  %p289_p2 = scmp.lt.s32.totalorder %s1206_s26, 3 }
   0x5   : > { %s1429_s27 = smov (%p32_p1, %s30_s27), 0  ;;  %p290_p3 = pnand %p958_p0, %p289_p2 }
   0x6   : > { %v1160_v0 = vld [vmem:[%s1421_s3 + $0x40] sm:$0xff] (!%p290_p3)   ;;  %v1208_v1 = vmov (!%p290_p3), 0.0   ;;  %v1161_v2 = vld [vmem:[%s1421_s3 + $0x48] sm:$0xff] (!%p290_p3)   ;;  %vm1209_vm0 = vmmov (!%p290_p3), 0   ;;  %p349_p4 = scmp.lt.s32.totalorder (!%p290_p3), %s1198_s24, 1  ;;  %v1162_v3 = vld [vmem:[%s1421_s3 + $0x50] sm:$0xff] (!%p290_p3)   ;;  %v441_v40 = vlaneseq (!%p290_p3) }
   0x7   : > { %293 = sbr.rel (%p290_p3) target bundleno = 305 (0x131), region = 44  ;;  %1087 = vmatprep.subr.bf16.mxu0 (!%p290_p3), %v1208_v1  ;;  %1067 = vmatprep.subr.bf16.mxu1 (!%p290_p3), %v1208_v1  ;;  %v1168_v4 = vld [vmem:[%s1421_s3] sm:$0xff] (!%p290_p3)   ;;  %v1163_v7 = vld [vmem:[%s1421_s3 + $0x58] sm:$0xff] (!%p290_p3)   ;;  %v1170_v10 = vld [vmem:[%s1421_s3 + $0x8] sm:$0xff] (!%p290_p3)   ;;  %vm423_vm1 = vcmask (!%p290_p3), 1040384   ;;  %vm450_vm4 = vcmask (!%p290_p3), 1047552  }
   0x8   : > { %1088 = vmatpush3.bf16.msra.mxu0 (!%p290_p3), %v1160_v0  ;;  %1103 = vmatprep.mubr.msk.bf16.mxu0 (!%p290_p3), %vm1209_vm0, %v1208_v1  ;;  %v964_v6 = vld [vmem:[%s1422_s4] ss:$0 sm:$0xff] (!%p290_p3)  ;;  %v1172_v15 = vld [vmem:[%s1421_s3 + $0x10] sm:$0xff] (!%p290_p3)   ;;  %v1165_v18 = vld [vmem:[%s1421_s3 + $0x68] sm:$0xff] (!%p290_p3)   ;;  %vm424_vm2 = vsmask.f32 (!%p290_p3), 256 }
   0x9   : > { %1089 = vmatprep.subr.bf16.mxu0 (!%p290_p3), %v1208_v1  ;;  %1083 = vmatprep.mubr.msk.bf16.mxu1 (!%p290_p3), %vm1209_vm0, %v1208_v1  ;;  %v1164_v11 = vld [vmem:[%s1421_s3 + $0x60] sm:$0xff] (!%p290_p3)   ;;  %v1174_v19 = vld [vmem:[%s1421_s3 + $0x18] sm:$0xff] (!%p290_p3)   ;;  %v1166_v22 = vld [vmem:[%s1421_s3 + $0x70] sm:$0xff] (!%p290_p3)   ;;  %v1210_v38 = vmov (!%p290_p3), 1966171168   ;;  %v442_v43 = vshrl.u32 (!%p290_p3), %v441_v40, 7 }
   0xa   : > { %1068 = vmatpush3.bf16.msra.mxu1 (!%p290_p3), %v1168_v4  ;;  %v965_v14 = vld [vmem:[%s1423_s5] ss:$0 sm:$0xff] (!%p290_p3)  ;;  %v1167_v25 = vld [vmem:[%s1421_s3 + $0x78] sm:$0xff] (!%p290_p3)   ;;  %v1178_v27 = vld [vmem:[%s1421_s3 + $0x28] sm:$0xff] (!%p290_p3)   ;;  %v439_v39 = vunpack.c.l.s4 (!%p290_p3), %v1210_v38  ;;  %vm451_vm5 = vsmask.f32 (!%p290_p3), 7424 }
   0xb   : > { %1069 = vmatprep.subr.bf16.mxu1 (!%p290_p3), %v1208_v1  ;;  %v1176_v23 = vld [vmem:[%s1421_s3 + $0x20] sm:$0xff] (!%p290_p3)   ;;  %v1180_v29 = vld [vmem:[%s1421_s3 + $0x30] sm:$0xff] (!%p290_p3)   ;;  %v1171_v32 = vld [vmem:[%s1421_s3 + $0x88] sm:$0xff] (!%p290_p3)  }
   0xc   : > { %1090 = vmatpush3.bf16.msra.mxu0 (!%p290_p3), %v1161_v2  ;;  %v1169_v28 = vld [vmem:[%s1421_s3 + $0x80] sm:$0xff] (!%p290_p3)   ;;  %v1182_v33 = vld [vmem:[%s1421_s3 + $0x38] sm:$0xff] (!%p290_p3)   ;;  %vm425_vm3 = vmand (!%p290_p3), %vm423_vm1, %vm424_vm2  ;;  %v440_v42 = vunpack.c.0.s8 (!%p290_p3), %v439_v39 }
   0xd   : > { %1091 = vmatprep.subr.bf16.mxu0 (!%p290_p3), %v1208_v1  ;;  %v1173_v36 = vld [vmem:[%s1421_s3 + $0x90] sm:$0xff] (!%p290_p3)   ;;  %v1175_v41 = vld [vmem:[%s1421_s3 + $0x98] sm:$0xff] (!%p290_p3)   ;;  %v1177_v44 = vld [vmem:[%s1421_s3 + $0xa0] sm:$0xff] (!%p290_p3)  }
   0xe   : > { %s1431_s24 = smov (!%p349_p4, %s1198_s24), 1  ;;  %1070 = vmatpush3.bf16.msra.mxu1 %v1170_v10  ;;  %v443_v45 = vsub.s32 %v440_v42, %v442_v43  ;;  %v1179_v47 = vld [vmem:[%s1421_s3 + $0xa8] sm:$0xff]   ;;  %v1181_v49 = vld [vmem:[%s1421_s3 + $0xb0] sm:$0xff]   ;;  %v1183_v52 = vld [vmem:[%s1421_s3 + $0xb8] sm:$0xff]  }
   0xf   : > { %s1027_s11 = sshll.u32 %s1431_s24, 3  ;;  %1071 = vmatprep.subr.bf16.mxu1 %v1208_v1  ;;  %s363_s10 = scalar_lea.vmem %s1419_s1, %s1431_s24  ;;  %vm452_vm6 = vmand %vm450_vm4, %vm451_vm5 }
  0x10   : > { %s356_s14 = scalar_lea.vmem %s1418_s0, %s1027_s11  ;;  %1092 = vmatpush3.bf16.msra.mxu0 %v1162_v3  ;;  %v413_v35 = vld [vmem:[%s363_s10] sm:$0x1]  ;;  %s369_s22 = scalar_lea.vmem %s1420_s2, %s1431_s24 }
  0x11   : > { %v1032_v5 = vld [vmem:[%s356_s14] sm:$0xff]   ;;  %1093 = vmatprep.subr.bf16.mxu0 %v1208_v1  ;;  %s378_s15 = scalar_lea.vmem %s1424_s6, %s1027_s11  ;;  %s963_s16 = sshll.u32 %s1431_s24, 1 }
  0x12   : > { %v1033_v8 = vunpack.c.l.bf16 %v1032_v5  ;;  %v1034_v9 = vunpack.c.h.bf16 %v1032_v5  ;;  %1072 = vmatpush3.bf16.msra.mxu1 %v1172_v15  ;;  %v966_v46 = vld.sshfl [vmem:[%s369_s22] sm:$0x1 pattern:$0x75316420]  ;;  %s386_s18 = scalar_lea.vmem %s1425_s7, %s963_s16 }
  0x13   : > { %1073 = vmatprep.subr.bf16.mxu1 %v1208_v1  ;;  %v444_v48 = vrot.slane %v966_v46, %v443_v45 }
  0x14   : > { %v399_v12 = vmul.f32 %v1033_v8, %v964_v6  ;;  %v400_v13 = vmul.f32 %v1034_v9, %v964_v6  ;;  %1094 = vmatpush3.bf16.msra.mxu0 %v1163_v7 }
  0x15   : > { %1095 = vmatprep.subr.bf16.mxu0 %v1208_v1  ;;  %v446_v51 = vshll.u32 %v444_v48, 16 }
  0x16   : > { %v408_v16 = vadd.f32 %v965_v14, %v399_v12  ;;  %v409_v17 = vadd.f32 %v965_v14, %v400_v13  ;;  %1074 = vmatpush3.bf16.msra.mxu1 %v1174_v19 }
  0x17   : > { %1075 = vmatprep.subr.bf16.mxu1 %v1208_v1  ;;  %v448_v54 = vrot.slane %v446_v51, 1 }
  0x18   : > { %1096 = vmatpush3.bf16.msra.mxu0 %v1164_v11  ;;  %v410_v20 = vmax.f32 %v408_v16, 0.0  ;;  %v411_v21 = vmax.f32 %v409_v17, 0.0 }
  0x19   : > { %1097 = vmatprep.subr.bf16.mxu0 %v1208_v1 }
  0x1a   : > { %v1335_v24 = vpack.c.bf16 %v411_v21, %v410_v20  ;;  %1076 = vmatpush3.bf16.msra.mxu1 %v1176_v23 }
  0x1b   : > { %1077 = vmatprep.subr.bf16.mxu1 %v1208_v1 }
  0x1c   : > { %1098 = vmatpush3.bf16.msra.mxu0 %v1165_v18  ;;  %v416_v26 = vshrl.u32 %v1335_v24, 16  ;;  %v419_v31 = vshll.u32 %v1335_v24, 16 }
  0x1d   : > { %1099 = vmatprep.subr.bf16.mxu0 %v1208_v1 }
  0x1e   : > { %1078 = vmatpush3.bf16.msra.mxu1 %v1178_v27  ;;  %v418_v30 = vrot.slane %v416_v26, 7  ;;  %v427_v50 = vrot.slane %v419_v31, 1 }
  0x1f   : > { %1079 = vmatprep.subr.bf16.mxu1 %v1208_v1 }
  0x20   : > { %1100 = vmatpush3.bf16.msra.mxu0 %v1166_v22  ;;  %v421_v34 = vor.u32 %v419_v31, %v418_v30  ;;  %v428_v53 = vor.u32 %v427_v50, %v416_v26 }
  0x21   : > { %1101 = vmatprep.subr.bf16.mxu0 %v1208_v1 }
  0x22   : > { %1080 = vmatpush3.bf16.msra.mxu1 %v1180_v29  ;;  %v426_v37 = vsel %vm425_vm3, %v413_v35, %v421_v34  ;;  %v453_v55 = vsel %vm452_vm6, %v428_v53, %v448_v54 }
  0x23   : > { %1081 = vmatprep.subr.bf16.mxu1 %v1208_v1 }
  0x24   : > { %1102 = vmatpush3.bf16.msra.mxu0 %v1167_v25 }
  0x25   : > { %1107 = vmatprep.subr.bf16.mxu0 %v1208_v1 }
  0x26   : > { %1082 = vmatpush3.bf16.msra.mxu1 %v1182_v33 }
  0x27   : > { %1104 = vmatmul.mubr.bf16.vlgmr.msra.gmra.mrb[0].mxu0 %v1335_v24 }
  0x28   : > { %1108 = vmatpush3.bf16.msra.mxu0 %v1169_v28  ;;  %1123 = vmatprep.mubr.msk.bf16.mxu0 %vm1209_vm0, %v1208_v1 }
  0x29   : > { %1109 = vmatprep.subr.bf16.mxu0 %v1208_v1  ;;  %1084 = vmatmul.mubr.bf16.vlgmr.msra.gmra.mrb[0].mxu1 %v426_v37 }
  0x2c   : > { %1110 = vmatpush3.bf16.msra.mxu0 %v1171_v32 }
  0x2d   : > { %1111 = vmatprep.subr.bf16.mxu0 %v1208_v1 }
  0x30   : > { %1112 = vmatpush3.bf16.msra.mxu0 %v1173_v36 }
  0x31   : > { %1113 = vmatprep.subr.bf16.mxu0 %v1208_v1 }
  0x34   : > { %1114 = vmatpush3.bf16.msra.mxu0 %v1175_v41 }
  0x35   : > { %1115 = vmatprep.subr.bf16.mxu0 %v1208_v1 }
  0x38   : > { %1116 = vmatpush3.bf16.msra.mxu0 %v1177_v44 }
  0x39   : > { %1117 = vmatprep.subr.bf16.mxu0 %v1208_v1 }
  0x3c   : > { %1118 = vmatpush3.bf16.msra.mxu0 %v1179_v47 }
  0x3d   : > { %1119 = vmatprep.subr.bf16.mxu0 %v1208_v1 }
  0x40   : > { %1120 = vmatpush3.bf16.msra.mxu0 %v1181_v49 }
  0x41   : > { %1121 = vmatprep.subr.bf16.mxu0 %v1208_v1 }
  0x44   : > { %1122 = vmatpush3.bf16.msra.mxu0 %v1183_v52 }
  0x47   : > { %1124 = vmatmul.mubr.bf16.vlgmr.msra.gmra.mrb[0].mxu0 %v453_v55 }
  0xfc   : > { %v569_v56 = vpop.f32.mrb[0].mxu1 }
  0xfd   : > { %v1085_v57 = vpop.f32.mrb[1].mxu1 }
  0xfe   : > { %v572_v58 = vpop.f32.mrb[2].mxu1 }
  0xff   : > { %v1086_v59 = vpop.f32.mrb[3].mxu1 }
 0x11a   : > { %v764_v60 = vpop.f32.mrb[0].mxu0 }
 0x11b   : > { %v1127_v61 = vadd.f32 %v764_v60, %v569_v56  ;;  %v1125_v62 = vpop.f32.mrb[1].mxu0 }
 0x11c   : > { %v767_v63 = vpop.f32.mrb[2].mxu0 }
 0x11d   : > { %v1128_v0 = vadd.f32 %v767_v63, %v572_v58  ;;  %v1126_v2 = vpop.f32.mrb[3].mxu0  ;;  %v790_v1 = vmul.f32 %v1127_v61, %v1127_v61 }
 0x11f   : > { %v1038_v3 = vpack.c.bf16 %v1128_v0, %v1127_v61  ;;  %v783_v4 = vadd.f32 %v1128_v0, %v1127_v61  ;;  %v791_v5 = vmul.f32 %v1128_v0, %v1128_v0 }
 0x121   : > { %1039 = vst [vmem:[%s378_s15] sm:$0xff] %v1038_v3   ;;  %v784_v6 = vrot.slane %v783_v4, 4  ;;  %v792_v7 = vadd.f32 %v791_v5, %v790_v1 }
 0x123   : > { %v785_v8 = vadd.f32 %v784_v6, %v783_v4  ;;  %v793_v9 = vrot.slane %v792_v7, 4 }
 0x125   : > { %v786_v10 = vrot.slane %v785_v8, 2  ;;  %v794_v11 = vadd.f32 %v793_v9, %v792_v7 }
 0x127   : > { %v787_v12 = vadd.f32 %v786_v10, %v785_v8  ;;  %v795_v13 = vrot.slane %v794_v11, 2 }
 0x129   : > { %v788_v14 = vrot.slane %v787_v12, 1  ;;  %v796_v15 = vadd.f32 %v795_v13, %v794_v11 }
 0x12b   : > { %v797_v16 = vrot.slane %v796_v15, 1  ;;  %v789_v17 = vadd.f32 %v788_v14, %v787_v12 }
 0x12d   : > { %v798_v18 = vadd.f32 %v797_v16, %v796_v15 }
 0x12f   : > { %v800_v19 = vsel %vm423_vm1, %v789_v17, %v798_v18 }
 0x130   : > { %801 = vst [vmem:[%s386_s18] sm:$0x3] %v800_v19 }
 0x131 PF: > { %s18_s26 = sadd.s32 1, %s1206_s26   ;;  %s1426_s24 = smov %s1202_s25 }
 0x132   : > { %p15_p5 = scmp.ge.s32.totalorder %s18_s26, 4   ;;  %s1427_s25 = smov %s1429_s27 }
 0x134   :  { %17 = sbr.rel (!%p15_p5) target bundleno = 2 (0x2), region = 94 }

</bundles_post_ra>
